<compile_context>
chip_gen: v5e
topology: v5e:2x2
jax: 0.10.0
libtpu: 0.0.40
codegen_flags: <defaults>
</compile_context>

<pallas_src>
import functools

import numpy as np
import jax
import jax.numpy as jnp
from jax.experimental import pallas as pl
from jax.experimental.pallas import tpu as pltpu

LOG_2PI = float(np.log(2.0 * np.pi))


def _unlabeled_logprob_kernel(x_ref, wa_ref, wb_ref, c_ref, out_ref, acc_ref,
                              *, d_tile, square_in_bf16):
    # x_ref :  (TB, TD) f32   flattened input tile (streamed over B and D)
    # wa_ref:  (D, K)   bf16  -0.5 * inv_var  (per class, transposed) -- VMEM-resident
    # wb_ref:  (D, K)   bf16  mu * inv_var    (per class, transposed) -- VMEM-resident
    # c_ref :  (1, K)   f32   per-class additive constant             -- VMEM-resident
    # out_ref: (TB, 1)  f32   mixture log-prob (written on last D step)
    # acc_ref: (TB, K)  f32   accumulator of per-class quadratic-form sums
    kd = pl.program_id(1)

    @pl.when(kd == 0)
    def _():
        # Fold the x-independent per-class constant into the accumulator init.
        acc_ref[...] = jnp.broadcast_to(c_ref[...], acc_ref.shape)

    x = x_ref[...]
    if square_in_bf16:
        # v6e / v7x: bf16 VALU -> halve vreg traffic for the elementwise square.
        xb = x.astype(jnp.bfloat16)
        xsq = xb * xb
    else:
        # v5e (no bf16 VALU): square in f32, cast once for the MXU.
        xf = x.astype(jnp.float32)
        xsq = (xf * xf).astype(jnp.bfloat16)
        xb = xf.astype(jnp.bfloat16)

    # Slice the current D chunk out of the resident weight slab (no per-step DMA).
    if wa_ref.shape[0] == d_tile:           # single D step: use the full slab
        wa = wa_ref[...]
        wb = wb_ref[...]
    else:
        d0 = pl.multiple_of(kd * d_tile, d_tile)
        wa = wa_ref[pl.ds(d0, d_tile), :]
        wb = wb_ref[pl.ds(d0, d_tile), :]

    # sum_d [-0.5*(x-mu)^2*iv] contribution of this D tile, on the MXU:
    acc_ref[...] += (
        jnp.dot(xsq, wa, preferred_element_type=jnp.float32)
        + jnp.dot(xb, wb, preferred_element_type=jnp.float32)
    )

    @pl.when(kd == pl.num_programs(1) - 1)
    def _():
        logp = acc_ref[...]                                               # (TB, K)
        m = jnp.max(logp, axis=-1, keepdims=True)
        lse = m + jnp.log(jnp.sum(jnp.exp(logp - m), axis=-1, keepdims=True))
        out_ref[...] = lse - jnp.log(jnp.float32(logp.shape[-1]))         # uniform prior


def _pick_divisor_tile(n, max_tile, quantum):
    """Largest tile <= max_tile that divides n and is a multiple of `quantum`
    (falls back to the full extent n, which always satisfies the layout rule)."""
    if n <= max_tile:
        return n
    start = max_tile - (max_tile % quantum)
    for t in range(start, 0, -quantum):
        if n % t == 0:
            return t
    return n


def _square_in_bf16_default():
    """bf16 VALU exists on v6e/v7x; fall back to the f32 square elsewhere."""
    try:
        kind = jax.devices()[0].device_kind.lower()
    except Exception:
        return False
    return ("v6" in kind) or ("v7" in kind)


def unlabeled_forward(x_nchw, class_means, class_log_stds, *, d_tile=None, b_tile=None):
    """Pallas equivalent of Unlabeled.forward: returns (x, logdet)."""
    B = x_nchw.shape[0]
    D = int(np.prod(x_nchw.shape[1:]))
    K = class_means.shape[0]
    assert class_means.shape == (K, D) and class_log_stds.shape == (K, D)

    if d_tile is None:
        d_tile = _pick_divisor_tile(D, 4096, 128)
    if b_tile is None:
        b_cap = 512
        if B >= 16:
            # Guarantee >= 2 batch tiles so the 'parallel' axis can shard across
            # both TensorCores on v7x (harmless single extra step elsewhere).
            b_cap = min(b_cap, max(8, (B // 2) // 8 * 8))
        b_tile = _pick_divisor_tile(B, b_cap, 8)
    assert D % d_tile == 0 and B % b_tile == 0

    x_flat = x_nchw.reshape(B, D).astype(jnp.float32)

    # Host/XLA precompute: fold exp(-2*log_std) and x-independent terms out of the kernel.
    mu = class_means.astype(jnp.float32)
    ls = class_log_stds.astype(jnp.float32)
    inv_var = jnp.exp(-2.0 * ls)                                     # (K, D)
    wa = (-0.5 * inv_var).T.astype(jnp.bfloat16)                     # (D, K)
    wb = (mu * inv_var).T.astype(jnp.bfloat16)                       # (D, K)
    c = (
        jnp.sum(-0.5 * mu * mu * inv_var - ls, axis=-1) - 0.5 * D * LOG_2PI
    ).reshape(1, K).astype(jnp.float32)                              # (1, K)

    # VMEM budget: double-buffered x tile + resident weights + accumulator/outputs.
    x_tile_bytes = 2 * b_tile * d_tile * 4
    w_bytes = 2 * (2 * D * K * 2) + 2 * K * 4
    misc_bytes = b_tile * K * 4 + 2 * b_tile * 4
    vmem_limit = min(60 * 1024 * 1024,
                     max(32 * 1024 * 1024,
                         int(1.5 * (x_tile_bytes + w_bytes + misc_bytes))))

    cost = pl.CostEstimate(
        flops=4 * B * D * K + B * D,
        transcendentals=B * K + B,
        bytes_accessed=B * D * 4 + 2 * D * K * 2 + (K + B) * 4,   # weights fetched once
    )

    kernel = functools.partial(
        _unlabeled_logprob_kernel,
        d_tile=d_tile,
        square_in_bf16=_square_in_bf16_default(),
    )

    logdet = pl.pallas_call(
        kernel,
        out_shape=jax.ShapeDtypeStruct((B, 1), jnp.float32),
        grid_spec=pltpu.PrefetchScalarGridSpec(
            num_scalar_prefetch=0,
            grid=(B // b_tile, D // d_tile),
            in_specs=[
                pl.BlockSpec((b_tile, d_tile), lambda b, k: (b, k)),
                # Weights/constants: full-array blocks with a constant index_map ->
                # DMA'd once, VMEM-resident for the whole grid.
                pl.BlockSpec((D, K), lambda b, k: (0, 0)),
                pl.BlockSpec((D, K), lambda b, k: (0, 0)),
                pl.BlockSpec((1, K), lambda b, k: (0, 0)),
            ],
            out_specs=pl.BlockSpec((b_tile, 1), lambda b, k: (b, 0)),
            scratch_shapes=[pltpu.VMEM((b_tile, K), jnp.float32)],
        ),
        compiler_params=pltpu.CompilerParams(
            # Batch tiles independent (megacore-shardable on v7x); the D axis is
            # the reduction -> output/accumulator resident -> 'arbitrary'.
            dimension_semantics=("parallel", "arbitrary"),
            vmem_limit_bytes=vmem_limit,
        ),
        cost_estimate=cost,
    )(x_flat, wa, wb, c)

    return x_nchw, logdet[:, 0]


def _ref_log_prob_unlabeled(x_nchw, class_means, class_log_stds):
    B = x_nchw.shape[0]
    xf = x_nchw.reshape(B, -1).astype(jnp.float32)
    diff = xf[:, None, :] - class_means[None, :, :]
    logp = jnp.sum(
        -0.5 * diff * diff * jnp.exp(-2.0 * class_log_stds)[None]
        - class_log_stds[None]
        - 0.5 * LOG_2PI,
        axis=-1,
    )
    return jax.scipy.special.logsumexp(logp, axis=-1) - jnp.log(
        jnp.float32(class_means.shape[0])
    )


if __name__ == "__main__":
    key = jax.random.PRNGKey(0)
    k_x, k_mu, k_ls = jax.random.split(key, 3)

    B, C, H, W = 2, 4, 16, 16           # NCHW, D = 1024
    K = 10                              # number of mixture classes
    D = C * H * W

    x = jax.random.normal(k_x, (B, C, H, W), dtype=jnp.float32)
    class_means = 0.1 * jax.random.normal(k_mu, (K, D), dtype=jnp.float32)
    class_log_stds = 0.05 * jax.random.normal(k_ls, (K, D), dtype=jnp.float32)

    y, logdet = unlabeled_forward(x, class_means, class_log_stds)
    jax.block_until_ready((y, logdet))

    # Forward returns the input unchanged plus the per-example mixture log-prob.
    assert y.shape == x.shape and logdet.shape == (B,)
    ref = _ref_log_prob_unlabeled(x, class_means, class_log_stds)
    # bf16 weight storage + bf16 MXU operands -> slightly looser tolerance than pure f32.
    np.testing.assert_allclose(np.asarray(logdet), np.asarray(ref), rtol=2e-3, atol=0.5)
    np.testing.assert_array_equal(np.asarray(y), np.asarray(x))

    # TODO(synk): `invert` with y=None requires dist.get_unlabeled_samples (RNG sampling);
    # only the deterministic forward / log-prob path is implemented here.
    print("KERNEL_OK")
</pallas_src>

<mosaic_0001>
module attributes {stable_mosaic.version = 11 : i64} {
  func.func @_unlabeled_logprob_kernel(%arg0: i32, %arg1: i32, %arg2: memref<2x1024xf32, #tpu.memory_space<vmem>>, %arg3: memref<1024x10xbf16, #tpu.memory_space<vmem>>, %arg4: memref<1024x10xbf16, #tpu.memory_space<vmem>>, %arg5: memref<1x10xf32, #tpu.memory_space<vmem>>, %arg6: memref<2x1xf32, #tpu.memory_space<vmem>>, %arg7: memref<2x10xf32, #tpu.memory_space<vmem>>) attributes {dimension_semantics = [#tpu.dimension_semantics<parallel>, #tpu.dimension_semantics<arbitrary>], iteration_bounds = array<i64: 1, 1>, scalar_prefetch = 0 : i64, scratch_operands = 1 : i64, tpu.core_type = #tpu.core_type<tc>, window_params = [{transform_indices = @transform_0, window_bounds = array<i64: 2, 1024>}, {pipeline_mode = #tpu.pipeline_mode<synchronous>, transform_indices = @transform_1, window_bounds = array<i64: 1024, 10>}, {pipeline_mode = #tpu.pipeline_mode<synchronous>, transform_indices = @transform_2, window_bounds = array<i64: 1024, 10>}, {pipeline_mode = #tpu.pipeline_mode<synchronous>, transform_indices = @transform_3, window_bounds = array<i64: 1, 10>}, {transform_indices = @transform_4, window_bounds = array<i64: 2, 1>}]} {
    %c0_i32 = arith.constant 0 : i32
    %0 = arith.cmpi eq, %arg1, %c0_i32 : i32
    %1 = arith.extui %0 : i1 to i32
    %c0_i32_0 = arith.constant 0 : i32
    %2 = arith.cmpi ne, %1, %c0_i32_0 : i32
    scf.if %2 {
      %c0_13 = arith.constant 0 : index
      %c0_14 = arith.constant 0 : index
      %18 = vector.load %arg5[%c0_13, %c0_14] : memref<1x10xf32, #tpu.memory_space<vmem>>, vector<1x10xf32>
      %19 = vector.shape_cast %18 : vector<1x10xf32> to vector<1x10xf32>
      %20 = vector.broadcast %19 : vector<1x10xf32> to vector<2x10xf32>
      %c0_15 = arith.constant 0 : index
      %c0_16 = arith.constant 0 : index
      %21 = vector.load %arg7[%c0_15, %c0_16] : memref<2x10xf32, #tpu.memory_space<vmem>>, vector<2x10xf32>
      tpu.vector_store %arg7[%c0_15, %c0_16], %20 {strides = array<i32>} : memref<2x10xf32, #tpu.memory_space<vmem>>, vector<2x10xf32>,
    } else {
    }
    %c0 = arith.constant 0 : index
    %c0_1 = arith.constant 0 : index
    %3 = vector.load %arg2[%c0, %c0_1] : memref<2x1024xf32, #tpu.memory_space<vmem>>, vector<2x1024xf32>
    %4 = arith.mulf %3, %3 : vector<2x1024xf32>
    %5 = arith.truncf %4 : vector<2x1024xf32> to vector<2x1024xbf16>
    %6 = arith.truncf %3 : vector<2x1024xf32> to vector<2x1024xbf16>
    %c0_2 = arith.constant 0 : index
    %c0_3 = arith.constant 0 : index
    %7 = vector.load %arg3[%c0_2, %c0_3] : memref<1024x10xbf16, #tpu.memory_space<vmem>>, vector<1024x10xbf16>
    %c0_4 = arith.constant 0 : index
    %c0_5 = arith.constant 0 : index
    %8 = vector.load %arg4[%c0_4, %c0_5] : memref<1024x10xbf16, #tpu.memory_space<vmem>>, vector<1024x10xbf16>
    %c0_6 = arith.constant 0 : index
    %c0_7 = arith.constant 0 : index
    %9 = vector.load %arg7[%c0_6, %c0_7] : memref<2x10xf32, #tpu.memory_space<vmem>>, vector<2x10xf32>
    %cst = arith.constant dense<0.000000e+00> : vector<2x10xf32>
    %10 = tpu.matmul %5, %7, %cst {dimension_numbers = #tpu.dot_dimension_numbers<[1], [0], [0], [1], [0, 0, 1, 1], [], []>} : vector<2x1024xbf16>, vector<1024x10xbf16>, vector<2x10xf32> -> vector<2x10xf32>
    %cst_8 = arith.constant dense<0.000000e+00> : vector<2x10xf32>
    %11 = tpu.matmul %6, %8, %cst_8 {dimension_numbers = #tpu.dot_dimension_numbers<[1], [0], [0], [1], [0, 0, 1, 1], [], []>} : vector<2x1024xbf16>, vector<1024x10xbf16>, vector<2x10xf32> -> vector<2x10xf32>
    %12 = arith.addf %10, %11 : vector<2x10xf32>
    %13 = arith.addf %9, %12 : vector<2x10xf32>
    %c0_9 = arith.constant 0 : index
    %c0_10 = arith.constant 0 : index
    %14 = vector.load %arg7[%c0_9, %c0_10] : memref<2x10xf32, #tpu.memory_space<vmem>>, vector<2x10xf32>
    tpu.vector_store %arg7[%c0_9, %c0_10], %13 {strides = array<i32>} : memref<2x10xf32, #tpu.memory_space<vmem>>, vector<2x10xf32>,
    %c0_i32_11 = arith.constant 0 : i32
    %15 = arith.cmpi eq, %arg1, %c0_i32_11 : i32
    %16 = arith.extui %15 : i1 to i32
    %c0_i32_12 = arith.constant 0 : i32
    %17 = arith.cmpi ne, %16, %c0_i32_12 : i32
    scf.if %17 {
      %c0_13 = arith.constant 0 : index
      %c0_14 = arith.constant 0 : index
      %18 = vector.load %arg7[%c0_13, %c0_14] : memref<2x10xf32, #tpu.memory_space<vmem>>, vector<2x10xf32>
      %cst_15 = arith.constant dense<0xFF800000> : vector<2xf32>
      %19 = vector.multi_reduction <maximumf>, %18, %cst_15 [1] : vector<2x10xf32> to vector<2xf32>
      %20 = vector.shape_cast %19 : vector<2xf32> to vector<2x1xf32>
      %21 = vector.broadcast %20 : vector<2x1xf32> to vector<2x10xf32>
      %22 = arith.subf %18, %21 : vector<2x10xf32>
      %23 = math.exp %22 : vector<2x10xf32>
      %cst_16 = arith.constant dense<0.000000e+00> : vector<2xf32>
      %24 = vector.multi_reduction <add>, %23, %cst_16 [1] : vector<2x10xf32> to vector<2xf32>
      %25 = vector.shape_cast %24 : vector<2xf32> to vector<2x1xf32>
      %26 = math.log %25 : vector<2x1xf32>
      %27 = arith.addf %20, %26 : vector<2x1xf32>
      %cst_17 = arith.constant 1.000000e+01 : f32
      %28 = math.log %cst_17 : f32
      %29 = vector.broadcast %28 : f32 to vector<2x1xf32>
      %30 = arith.subf %27, %29 : vector<2x1xf32>
      %c0_18 = arith.constant 0 : index
      %c0_19 = arith.constant 0 : index
      %31 = vector.load %arg6[%c0_18, %c0_19] : memref<2x1xf32, #tpu.memory_space<vmem>>, vector<2x1xf32>
      tpu.vector_store %arg6[%c0_18, %c0_19], %30 {strides = array<i32>} : memref<2x1xf32, #tpu.memory_space<vmem>>, vector<2x1xf32>,
    } else {
    }
    return
  }
  func.func @transform_0(%arg0: i32, %arg1: i32) -> (i32, i32) {
    %c0_i32 = arith.constant 0 : i32
    return %arg0, %arg1 : i32, i32
  }
  func.func @transform_1(%arg0: i32, %arg1: i32) -> (i32, i32) {
    %c0_i32 = arith.constant 0 : i32
    %c0_i32_0 = arith.constant 0 : i32
    %c0_i32_1 = arith.constant 0 : i32
    return %c0_i32, %c0_i32_0 : i32, i32
  }
  func.func @transform_2(%arg0: i32, %arg1: i32) -> (i32, i32) {
    %c0_i32 = arith.constant 0 : i32
    %c0_i32_0 = arith.constant 0 : i32
    %c0_i32_1 = arith.constant 0 : i32
    return %c0_i32, %c0_i32_0 : i32, i32
  }
  func.func @transform_3(%arg0: i32, %arg1: i32) -> (i32, i32) {
    %c0_i32 = arith.constant 0 : i32
    %c0_i32_0 = arith.constant 0 : i32
    %c0_i32_1 = arith.constant 0 : i32
    return %c0_i32, %c0_i32_0 : i32, i32
  }
  func.func @transform_4(%arg0: i32, %arg1: i32) -> (i32, i32) {
    %c0_i32 = arith.constant 0 : i32
    %c0_i32_0 = arith.constant 0 : i32
    return %arg0, %c0_i32 : i32, i32
  }
}

</mosaic_0001>

<bundles_post_ra>
// kernel: tpu_custom_call.1
= control target key start
LH: loop header
LB: loop body
LE: loop exit
PB: predicated region body
PF: predicated region fallthrough
CT: control target
= control target key end

     0   :  { %vm25_vm0 = vcmask 74752   ;;  %vm1342_vm1 = vcmask 1024   ;;  %s2451_s2 = inlined_call_operand.vmem [shape: bf16[1024,10], index: 2, kind: input, shape index: {}]   ;;  %s2452_s0 = inlined_call_operand.vmem [shape: f32[2,1024], index: 0, kind: input, shape index: {}]   ;;  %s2453_s1 = inlined_call_operand.vmem [shape: bf16[1024,10], index: 1, kind: input, shape index: {}]   ;;  %s2454_s3 = inlined_call_operand.vmem [shape: f32[1,10], index: 3, kind: input, shape index: {}]   ;;  %s2455_s4 = inlined_call_operand.vmem [shape: f32[2,1], index: 4, kind: output, shape index: {}]  }
   0x1   :  { %v1932_v0 = vld [vmem:[%s2451_s2 + $0x38] sm:$0xff]  ;;  %v1931_v4 = vld [vmem:[%s2451_s2 + $0x30] sm:$0xff]  ;;  %v1930_v8 = vld [vmem:[%s2451_s2 + $0x28] sm:$0xff] }
   0x2   :  { %v1940_v1 = vld [vmem:[%s2451_s2 + $0x78] sm:$0xff]  ;;  %730 = vmatpush.bf16.msra.mxu0 %v1932_v0  ;;  %v1939_v5 = vld [vmem:[%s2451_s2 + $0x70] sm:$0xff]  ;;  %v1938_v9 = vld [vmem:[%s2451_s2 + $0x68] sm:$0xff] }
   0x3   :  { %v1948_v2 = vld [vmem:[%s2451_s2 + $0xb8] sm:$0xff]  ;;  %743 = vmatpush.bf16.msra.mxu1 %v1940_v1  ;;  %v1947_v6 = vld [vmem:[%s2451_s2 + $0xb0] sm:$0xff]  ;;  %v1946_v10 = vld [vmem:[%s2451_s2 + $0xa8] sm:$0xff] }
   0x4   :  { %v1956_v3 = vld [vmem:[%s2451_s2 + $0xf8] sm:$0xff]  ;;  %756 = vmatpush.bf16.msra.mxu2 %v1948_v2  ;;  %v1955_v7 = vld [vmem:[%s2451_s2 + $0xf0] sm:$0xff]  ;;  %v1954_v11 = vld [vmem:[%s2451_s2 + $0xe8] sm:$0xff] }
   0x5   :  { %769 = vmatpush.bf16.msra.mxu3 %v1956_v3  ;;  %v1929_v12 = vld [vmem:[%s2451_s2 + $0x20] sm:$0xff]  ;;  %v1928_v16 = vld [vmem:[%s2451_s2 + $0x18] sm:$0xff]  ;;  %v28_v21 = vld [vmem:[%s2452_s0 + $0x8] sm:$0xff] }
   0x6   :  { %731 = vmatpush.bf16.msra.mxu0 %v1931_v4  ;;  %v1937_v13 = vld [vmem:[%s2451_s2 + $0x60] sm:$0xff]  ;;  %v1936_v17 = vld [vmem:[%s2451_s2 + $0x58] sm:$0xff]  ;;  %v1927_v22 = vld [vmem:[%s2451_s2 + $0x10] sm:$0xff]  ;;  %v30_v25 = vmul.f32 %v28_v21, %v28_v21 }
   0x7   :  { %744 = vmatpush.bf16.msra.mxu1 %v1939_v5  ;;  %v1945_v14 = vld [vmem:[%s2451_s2 + $0xa0] sm:$0xff]  ;;  %v1944_v18 = vld [vmem:[%s2451_s2 + $0x98] sm:$0xff]  ;;  %v1935_v23 = vld [vmem:[%s2451_s2 + $0x50] sm:$0xff] }
   0x8   :  { %757 = vmatpush.bf16.msra.mxu2 %v1947_v6  ;;  %v1953_v15 = vld [vmem:[%s2451_s2 + $0xe0] sm:$0xff]  ;;  %v1952_v19 = vld [vmem:[%s2451_s2 + $0xd8] sm:$0xff]  ;;  %v1943_v26 = vld [vmem:[%s2451_s2 + $0x90] sm:$0xff]  ;;  %35 = vst [vmem:[#allocation1 + $0x20] ss:$4 sm:$0xff] %v30_v25 }
   0x9   :  { %770 = vmatpush.bf16.msra.mxu3 %v1955_v7  ;;  %v27_v20 = vld [vmem:[%s2452_s0] sm:$0xff]  ;;  %v1951_v27 = vld [vmem:[%s2451_s2 + $0xd0] sm:$0xff]  ;;  %v1926_v28 = vld [vmem:[%s2451_s2 + $0x8] sm:$0xff] }
   0xa   :  { %732 = vmatpush.bf16.msra.mxu0 %v1930_v8  ;;  %v29_v24 = vmul.f32 %v27_v20, %v27_v20  ;;  %v1934_v29 = vld [vmem:[%s2451_s2 + $0x48] sm:$0xff]  ;;  %v1925_v32 = vld [vmem:[%s2451_s2] sm:$0xff]  ;;  %v1964_v36 = vld [vmem:[%s2451_s2 + $0x138] sm:$0xff] }
   0xb   :  { %745 = vmatpush.bf16.msra.mxu1 %v1938_v9  ;;  %v1942_v30 = vld [vmem:[%s2451_s2 + $0x88] sm:$0xff]  ;;  %v1933_v33 = vld [vmem:[%s2451_s2 + $0x40] sm:$0xff]  ;;  %v1972_v37 = vld [vmem:[%s2451_s2 + $0x178] sm:$0xff] }
   0xc   :  { %758 = vmatpush.bf16.msra.mxu2 %v1946_v10  ;;  %33 = vst [vmem:[#allocation1] ss:$4 sm:$0xff] %v29_v24  ;;  %v1950_v31 = vld [vmem:[%s2451_s2 + $0xc8] sm:$0xff]  ;;  %v1941_v34 = vld [vmem:[%s2451_s2 + $0x80] sm:$0xff]  ;;  %v1980_v42 = vld [vmem:[%s2451_s2 + $0x1b8] sm:$0xff] }
   0xd   :  { %771 = vmatpush.bf16.msra.mxu3 %v1954_v11  ;;  %v1949_v35 = vld [vmem:[%s2451_s2 + $0xc0] sm:$0xff]  ;;  %v1988_v43 = vld [vmem:[%s2451_s2 + $0x1f8] sm:$0xff]  ;;  %v1963_v44 = vld [vmem:[%s2451_s2 + $0x130] sm:$0xff] }
   0xe   :  { %733 = vmatpush.bf16.msra.mxu0 %v1929_v12  ;;  %v1971_v45 = vld [vmem:[%s2451_s2 + $0x170] sm:$0xff]  ;;  %v1962_v51 = vld [vmem:[%s2451_s2 + $0x128] sm:$0xff]  ;;  %v1961_v0 = vld [vmem:[%s2451_s2 + $0x120] sm:$0xff] }
   0xf   :  { %746 = vmatpush.bf16.msra.mxu1 %v1937_v13  ;;  %v2147_v46 = vld.sshfl [vmem:[#allocation1 + $0x20] sm:$0xff pattern:$0x73625140]  ;;  %v2149_v47 = vld.sshfl [vmem:[#allocation1 + $0x28] sm:$0xff pattern:$0x73625140] }
  0x10   :  { %759 = vmatpush.bf16.msra.mxu2 %v1945_v14  ;;  %v2151_v48 = vld.sshfl [vmem:[#allocation1 + $0x30] sm:$0xff pattern:$0x73625140]  ;;  %v2162_v52 = vld.sshfl [vmem:[#allocation1 + $0x38] sm:$0xff pattern:$0x73625140] }
  0x11   :  { %772 = vmatpush.bf16.msra.mxu3 %v1953_v15  ;;  %v1979_v49 = vld [vmem:[%s2451_s2 + $0x1b0] sm:$0xff]  ;;  %v1970_v53 = vld [vmem:[%s2451_s2 + $0x168] sm:$0xff]  ;;  %64 = vst [vmem:[#allocation1 + $0x20] ss:$4 sm:$0xff] %v28_v21  ;;  %v1969_v1 = vld [vmem:[%s2451_s2 + $0x160] sm:$0xff] }
  0x12   :  { %734 = vmatpush.bf16.msra.mxu0 %v1928_v16  ;;  %v1987_v50 = vld [vmem:[%s2451_s2 + $0x1f0] sm:$0xff]  ;;  %v1978_v54 = vld [vmem:[%s2451_s2 + $0x1a8] sm:$0xff]  ;;  %v1977_v2 = vld [vmem:[%s2451_s2 + $0x1a0] sm:$0xff] }
  0x13   :  { %747 = vmatpush.bf16.msra.mxu1 %v1936_v17  ;;  %v2127_v38 = vld.sshfl [vmem:[#allocation1] sm:$0xff pattern:$0x73625140]  ;;  %v2129_v39 = vld.sshfl [vmem:[#allocation1 + $0x8] sm:$0xff pattern:$0x73625140] }
  0x14   :  { %760 = vmatpush.bf16.msra.mxu2 %v1944_v18  ;;  %v2131_v40 = vld.sshfl [vmem:[#allocation1 + $0x10] sm:$0xff pattern:$0x73625140]  ;;  %v2133_v41 = vld.sshfl [vmem:[#allocation1 + $0x18] sm:$0xff pattern:$0x73625140] }
  0x15   :  { %773 = vmatpush.bf16.msra.mxu3 %v1952_v19  ;;  %62 = vst [vmem:[#allocation1] ss:$4 sm:$0xff] %v27_v20  ;;  %v1986_v55 = vld [vmem:[%s2451_s2 + $0x1e8] sm:$0xff]  ;;  %v1985_v3 = vld [vmem:[%s2451_s2 + $0x1e0] sm:$0xff]  ;;  %v1960_v4 = vld [vmem:[%s2451_s2 + $0x118] sm:$0xff] }
  0x16   :  { %735 = vmatpush.bf16.msra.mxu0 %v1927_v22  ;;  %v1968_v5 = vld [vmem:[%s2451_s2 + $0x158] sm:$0xff]  ;;  %v1959_v8 = vld [vmem:[%s2451_s2 + $0x110] sm:$0xff]  ;;  %v1958_v12 = vld [vmem:[%s2451_s2 + $0x108] sm:$0xff] }
  0x17   :  { %748 = vmatpush.bf16.msra.mxu1 %v1935_v23  ;;  %v1976_v6 = vld [vmem:[%s2451_s2 + $0x198] sm:$0xff]  ;;  %v1967_v9 = vld [vmem:[%s2451_s2 + $0x150] sm:$0xff]  ;;  %v1966_v13 = vld [vmem:[%s2451_s2 + $0x148] sm:$0xff] }
  0x18   :  { %761 = vmatpush.bf16.msra.mxu2 %v1943_v26  ;;  %v1984_v7 = vld [vmem:[%s2451_s2 + $0x1d8] sm:$0xff]  ;;  %v1975_v10 = vld [vmem:[%s2451_s2 + $0x190] sm:$0xff]  ;;  %v1974_v14 = vld [vmem:[%s2451_s2 + $0x188] sm:$0xff] }
  0x19   :  { %774 = vmatpush.bf16.msra.mxu3 %v1951_v27  ;;  %v1983_v11 = vld [vmem:[%s2451_s2 + $0x1d0] sm:$0xff]  ;;  %v1982_v15 = vld [vmem:[%s2451_s2 + $0x1c8] sm:$0xff]  ;;  %v1957_v16 = vld [vmem:[%s2451_s2 + $0x100] sm:$0xff] }
  0x1a   :  { %736 = vmatpush.bf16.msra.mxu0 %v1926_v28  ;;  %v1965_v17 = vld [vmem:[%s2451_s2 + $0x140] sm:$0xff]  ;;  %v1868_v20 = vld [vmem:[%s2453_s1 + $0x38] sm:$0xff]  ;;  %v71_v22 = vld.sshfl [vmem:[#allocation1 + $0x30] sm:$0xff pattern:$0x73625140] }
  0x1b   :  { %749 = vmatpush.bf16.msra.mxu1 %v1934_v29  ;;  %v1973_v18 = vld [vmem:[%s2451_s2 + $0x180] sm:$0xff]  ;;  %v1876_v21 = vld [vmem:[%s2453_s1 + $0x78] sm:$0xff]  ;;  %v70_v25 = vld.sshfl [vmem:[#allocation1 + $0x28] sm:$0xff pattern:$0x73625140]  ;;  %v87_v28 = vpack.c.bf16 %v71_v22, %v71_v22 }
  0x1c   :  { %762 = vmatpush.bf16.msra.mxu2 %v1942_v30  ;;  %v67_v56 = vld.sshfl [vmem:[#allocation1 + $0x10] sm:$0xff pattern:$0x73625140]  ;;  %v65_v57 = vld.sshfl [vmem:[#allocation1] sm:$0xff pattern:$0x73625140] }
  0x1d   :  { %775 = vmatpush.bf16.msra.mxu3 %v1950_v31  ;;  %v83_v58 = vpack.c.bf16 %v67_v56, %v67_v56  ;;  %v81_v59 = vpack.c.bf16 %v65_v57, %v65_v57  ;;  %v68_v60 = vld.sshfl [vmem:[#allocation1 + $0x18] sm:$0xff pattern:$0x73625140]  ;;  %v66_v61 = vld.sshfl [vmem:[#allocation1 + $0x8] sm:$0xff pattern:$0x73625140]  ;;  %v86_v31 = vpack.c.bf16 %v70_v25, %v70_v25 }
  0x1e   :  { %737 = vmatpush.bf16.msra.mxu0 %v1925_v32  ;;  %v84_v62 = vpack.c.bf16 %v68_v60, %v68_v60  ;;  %v82_v63 = vpack.c.bf16 %v66_v61, %v66_v61  ;;  %v1981_v19 = vld [vmem:[%s2451_s2 + $0x1c0] sm:$0xff]  ;;  %v72_v24 = vld.sshfl [vmem:[#allocation1 + $0x38] sm:$0xff pattern:$0x73625140]  ;;  %v1867_v32 = vld [vmem:[%s2453_s1 + $0x30] sm:$0xff] }
  0x1f   :  { %750 = vmatpush.bf16.msra.mxu1 %v1933_v33  ;;  %v69_v23 = vld.sshfl [vmem:[#allocation1 + $0x20] sm:$0xff pattern:$0x73625140]  ;;  %v1884_v26 = vld [vmem:[%s2453_s1 + $0xb8] sm:$0xff]  ;;  %v88_v30 = vpack.c.bf16 %v72_v24, %v72_v24  ;;  %v1875_v33 = vld [vmem:[%s2453_s1 + $0x70] sm:$0xff] }
  0x20   :  { %763 = vmatpush.bf16.msra.mxu2 %v1941_v34  ;;  %v1892_v27 = vld [vmem:[%s2453_s1 + $0xf8] sm:$0xff]  ;;  %v85_v29 = vpack.c.bf16 %v69_v23, %v69_v23  ;;  %v1883_v34 = vld [vmem:[%s2453_s1 + $0xb0] sm:$0xff]  ;;  %v1862_v60 = vld [vmem:[%s2453_s1 + $0x8] sm:$0xff] }
  0x21   :  { %776 = vmatpush.bf16.msra.mxu3 %v1949_v35  ;;  %738 = vmatmul.bf16.vlgmr.msra.gmra.mxu0 %v81_v59  ;;  %v1891_v35 = vld [vmem:[%s2453_s1 + $0xf0] sm:$0xff]  ;;  %v1870_v61 = vld [vmem:[%s2453_s1 + $0x48] sm:$0xff]  ;;  %v1912_v22 = vld [vmem:[%s2453_s1 + $0x198] sm:$0xff] }
  0x22   :  { %782 = vmatpush.bf16.msrb.mxu0 %v1964_v36  ;;  %751 = vmatmul.bf16.vlgmr.msra.gmra.mxu1 %v82_v63  ;;  %v1866_v36 = vld [vmem:[%s2453_s1 + $0x28] sm:$0xff]  ;;  %v1863_v56 = vld [vmem:[%s2453_s1 + $0x10] sm:$0xff]  ;;  %v1920_v23 = vld [vmem:[%s2453_s1 + $0x1d8] sm:$0xff] }
  0x23   :  { %795 = vmatpush.bf16.msrb.mxu1 %v1972_v37  ;;  %764 = vmatmul.bf16.vlgmr.msra.gmra.mxu2 %v83_v58  ;;  %v1874_v37 = vld [vmem:[%s2453_s1 + $0x68] sm:$0xff]  ;;  %v1871_v57 = vld [vmem:[%s2453_s1 + $0x50] sm:$0xff] }
  0x24   :  { %808 = vmatpush.bf16.msrb.mxu2 %v1980_v42  ;;  %777 = vmatmul.bf16.vlgmr.msra.gmra.mxu3 %v84_v62  ;;  %v1882_v42 = vld [vmem:[%s2453_s1 + $0xa8] sm:$0xff]  ;;  %v1879_v58 = vld [vmem:[%s2453_s1 + $0x90] sm:$0xff] }
  0x25   :  { %821 = vmatpush.bf16.msrb.mxu3 %v1988_v43  ;;  %v1890_v43 = vld [vmem:[%s2453_s1 + $0xe8] sm:$0xff]  ;;  %v1887_v59 = vld [vmem:[%s2453_s1 + $0xd0] sm:$0xff] }
  0x26   :  { %783 = vmatpush.bf16.msrb.mxu0 %v1963_v44  ;;  %v1865_v44 = vld [vmem:[%s2453_s1 + $0x20] sm:$0xff]  ;;  %v1878_v62 = vld [vmem:[%s2453_s1 + $0x88] sm:$0xff]  ;;  %v1895_v24 = vld [vmem:[%s2453_s1 + $0x110] sm:$0xff] }
  0x27   :  { %796 = vmatpush.bf16.msrb.mxu1 %v1971_v45  ;;  %v1873_v45 = vld [vmem:[%s2453_s1 + $0x60] sm:$0xff]  ;;  %v1886_v63 = vld [vmem:[%s2453_s1 + $0xc8] sm:$0xff]  ;;  %v1903_v25 = vld [vmem:[%s2453_s1 + $0x150] sm:$0xff] }
  0x28   :  { %809 = vmatpush.bf16.msrb.mxu2 %v1979_v49  ;;  %v1881_v49 = vld [vmem:[%s2453_s1 + $0xa0] sm:$0xff] }
  0x29   :  { %822 = vmatpush.bf16.msrb.mxu3 %v1987_v50  ;;  %v1889_v50 = vld [vmem:[%s2453_s1 + $0xe0] sm:$0xff] }
  0x2a   :  { %784 = vmatpush.bf16.msrb.mxu0 %v1962_v51  ;;  %v1864_v51 = vld [vmem:[%s2453_s1 + $0x18] sm:$0xff] }
  0x2b   :  { %797 = vmatpush.bf16.msrb.mxu1 %v1970_v53  ;;  %v1872_v53 = vld [vmem:[%s2453_s1 + $0x58] sm:$0xff] }
  0x2c   :  { %810 = vmatpush.bf16.msrb.mxu2 %v1978_v54  ;;  %v1880_v54 = vld [vmem:[%s2453_s1 + $0x98] sm:$0xff] }
  0x2d   :  { %823 = vmatpush.bf16.msrb.mxu3 %v1986_v55  ;;  %v1888_v55 = vld [vmem:[%s2453_s1 + $0xd8] sm:$0xff] }
  0x2e   :  { %785 = vmatpush.bf16.msrb.mxu0 %v1961_v0  ;;  %v1861_v0 = vld [vmem:[%s2453_s1] sm:$0xff] }
  0x2f   :  { %798 = vmatpush.bf16.msrb.mxu1 %v1969_v1  ;;  %v1869_v1 = vld [vmem:[%s2453_s1 + $0x40] sm:$0xff] }
  0x30   :  { %811 = vmatpush.bf16.msrb.mxu2 %v1977_v2  ;;  %v1877_v2 = vld [vmem:[%s2453_s1 + $0x80] sm:$0xff] }
  0x31   :  { %824 = vmatpush.bf16.msrb.mxu3 %v1985_v3  ;;  %v1885_v3 = vld [vmem:[%s2453_s1 + $0xc0] sm:$0xff] }
  0x32   :  { %786 = vmatpush.bf16.msrb.mxu0 %v1960_v4  ;;  %v1900_v4 = vld [vmem:[%s2453_s1 + $0x138] sm:$0xff] }
  0x33   :  { %799 = vmatpush.bf16.msrb.mxu1 %v1968_v5  ;;  %v1908_v5 = vld [vmem:[%s2453_s1 + $0x178] sm:$0xff] }
  0x34   :  { %812 = vmatpush.bf16.msrb.mxu2 %v1976_v6  ;;  %v1916_v6 = vld [vmem:[%s2453_s1 + $0x1b8] sm:$0xff] }
  0x35   :  { %825 = vmatpush.bf16.msrb.mxu3 %v1984_v7  ;;  %v1924_v7 = vld [vmem:[%s2453_s1 + $0x1f8] sm:$0xff] }
  0x36   :  { %787 = vmatpush.bf16.msrb.mxu0 %v1959_v8  ;;  %v52_v8 = vpack.c.bf16 %v2127_v38, %v2127_v38  ;;  %v1907_v38 = vld [vmem:[%s2453_s1 + $0x170] sm:$0xff] }
  0x37   :  { %800 = vmatpush.bf16.msrb.mxu1 %v1967_v9  ;;  %v54_v9 = vpack.c.bf16 %v2131_v40, %v2131_v40  ;;  %v1915_v40 = vld [vmem:[%s2453_s1 + $0x1b0] sm:$0xff] }
  0x38   :  { %813 = vmatpush.bf16.msrb.mxu2 %v1975_v10  ;;  %v53_v10 = vpack.c.bf16 %v2129_v39, %v2129_v39  ;;  %v1923_v39 = vld [vmem:[%s2453_s1 + $0x1f0] sm:$0xff] }
  0x39   :  { %826 = vmatpush.bf16.msrb.mxu3 %v1983_v11  ;;  %v55_v11 = vpack.c.bf16 %v2133_v41, %v2133_v41  ;;  %v1898_v41 = vld [vmem:[%s2453_s1 + $0x128] sm:$0xff] }
  0x3a   :  { %788 = vmatpush.bf16.msrb.mxu0 %v1958_v12  ;;  %v1899_v12 = vld [vmem:[%s2453_s1 + $0x130] sm:$0xff] }
  0x3b   :  { %801 = vmatpush.bf16.msrb.mxu1 %v1966_v13  ;;  %v1906_v13 = vld [vmem:[%s2453_s1 + $0x168] sm:$0xff] }
  0x3c   :  { %814 = vmatpush.bf16.msrb.mxu2 %v1974_v14  ;;  %v1914_v14 = vld [vmem:[%s2453_s1 + $0x1a8] sm:$0xff] }
  0x3d   :  { %827 = vmatpush.bf16.msrb.mxu3 %v1982_v15  ;;  %v1922_v15 = vld [vmem:[%s2453_s1 + $0x1e8] sm:$0xff] }
  0x3e   :  { %789 = vmatpush.bf16.msrb.mxu0 %v1957_v16  ;;  %v1897_v16 = vld [vmem:[%s2453_s1 + $0x120] sm:$0xff] }
  0x3f   :  { %802 = vmatpush.bf16.msrb.mxu1 %v1965_v17  ;;  %v1905_v17 = vld [vmem:[%s2453_s1 + $0x160] sm:$0xff] }
  0x40   :  { %815 = vmatpush.bf16.msrb.mxu2 %v1973_v18  ;;  %v1913_v18 = vld [vmem:[%s2453_s1 + $0x1a0] sm:$0xff] }
  0x41   :  { %828 = vmatpush.bf16.msrb.mxu3 %v1981_v19  ;;  %790 = vmatmul.bf16.vlgmr.msrb.gmra.mxu0 %v85_v29  ;;  %v1921_v19 = vld [vmem:[%s2453_s1 + $0x1e0] sm:$0xff]  ;;  %v1902_v29 = vld [vmem:[%s2453_s1 + $0x148] sm:$0xff] }
  0x42   :  { %1218 = vmatpush.bf16.msra.mxu0 %v1868_v20  ;;  %803 = vmatmul.bf16.vlgmr.msrb.gmra.mxu1 %v86_v31  ;;  %v1896_v20 = vld [vmem:[%s2453_s1 + $0x118] sm:$0xff]  ;;  %v1918_v31 = vld [vmem:[%s2453_s1 + $0x1c8] sm:$0xff] }
  0x43   :  { %1231 = vmatpush.bf16.msra.mxu1 %v1876_v21  ;;  %816 = vmatmul.bf16.vlgmr.msrb.gmra.mxu2 %v87_v28  ;;  %v1904_v21 = vld [vmem:[%s2453_s1 + $0x158] sm:$0xff]  ;;  %v1894_v28 = vld [vmem:[%s2453_s1 + $0x108] sm:$0xff] }
  0x44   :  { %1244 = vmatpush.bf16.msra.mxu2 %v1884_v26  ;;  %829 = vmatmul.bf16.vlgmr.msrb.gmra.mxu3 %v88_v30  ;;  %v1911_v26 = vld [vmem:[%s2453_s1 + $0x190] sm:$0xff]  ;;  %v1910_v30 = vld [vmem:[%s2453_s1 + $0x188] sm:$0xff] }
  0x45   :  { %1257 = vmatpush.bf16.msra.mxu3 %v1892_v27  ;;  %v1919_v27 = vld [vmem:[%s2453_s1 + $0x1d0] sm:$0xff] }
  0x46   :  { %1219 = vmatpush.bf16.msra.mxu0 %v1867_v32  ;;  %v1893_v32 = vld [vmem:[%s2453_s1 + $0x100] sm:$0xff] }
  0x47   :  { %1232 = vmatpush.bf16.msra.mxu1 %v1875_v33  ;;  %v1901_v33 = vld [vmem:[%s2453_s1 + $0x140] sm:$0xff] }
  0x48   :  { %1245 = vmatpush.bf16.msra.mxu2 %v1883_v34  ;;  %v1909_v34 = vld [vmem:[%s2453_s1 + $0x180] sm:$0xff] }
  0x49   :  { %1258 = vmatpush.bf16.msra.mxu3 %v1891_v35  ;;  %v1917_v35 = vld [vmem:[%s2453_s1 + $0x1c0] sm:$0xff] }
  0x4a   :  { %1220 = vmatpush.bf16.msra.mxu0 %v1866_v36  ;;  %v56_v36 = vpack.c.bf16 %v2147_v46, %v2147_v46 }
  0x4b   :  { %1233 = vmatpush.bf16.msra.mxu1 %v1874_v37  ;;  %v57_v37 = vpack.c.bf16 %v2149_v47, %v2149_v47 }
  0x4c   :  { %1246 = vmatpush.bf16.msra.mxu2 %v1882_v42  ;;  %v58_v42 = vpack.c.bf16 %v2151_v48, %v2151_v48 }
  0x4d   :  { %1259 = vmatpush.bf16.msra.mxu3 %v1890_v43  ;;  %v59_v43 = vpack.c.bf16 %v2162_v52, %v2162_v52 }
  0x4e   :  { %1221 = vmatpush.bf16.msra.mxu0 %v1865_v44 }
  0x4f   :  { %1234 = vmatpush.bf16.msra.mxu1 %v1873_v45 }
  0x50   :  { %1247 = vmatpush.bf16.msra.mxu2 %v1881_v49 }
  0x51   :  { %1260 = vmatpush.bf16.msra.mxu3 %v1889_v50 }
  0x52   :  { %1222 = vmatpush.bf16.msra.mxu0 %v1864_v51 }
  0x53   :  { %1235 = vmatpush.bf16.msra.mxu1 %v1872_v53 }
  0x54   :  { %1248 = vmatpush.bf16.msra.mxu2 %v1880_v54 }
  0x55   :  { %1261 = vmatpush.bf16.msra.mxu3 %v1888_v55 }
  0x56   :  { %1223 = vmatpush.bf16.msra.mxu0 %v1863_v56 }
  0x57   :  { %1236 = vmatpush.bf16.msra.mxu1 %v1871_v57 }
  0x58   :  { %1249 = vmatpush.bf16.msra.mxu2 %v1879_v58 }
  0x59   :  { %1262 = vmatpush.bf16.msra.mxu3 %v1887_v59 }
  0x5a   :  { %1224 = vmatpush.bf16.msra.mxu0 %v1862_v60 }
  0x5b   :  { %1237 = vmatpush.bf16.msra.mxu1 %v1870_v61 }
  0x5c   :  { %1250 = vmatpush.bf16.msra.mxu2 %v1878_v62  ;;  %v1989_v62 = vld [vmem:[%s2454_s3] ss:$0 sm:$0xff] }
  0x5d   :  { %1263 = vmatpush.bf16.msra.mxu3 %v1886_v63  ;;  %26 = vst.msk [vmem:[#allocation2] sm:$0x3] %vm25_vm0, %v1989_v62 }
  0x5e   :  { %1225 = vmatpush.bf16.msra.mxu0 %v1861_v0 }
  0x5f   :  { %1238 = vmatpush.bf16.msra.mxu1 %v1869_v1 }
  0x60   :  { %1251 = vmatpush.bf16.msra.mxu2 %v1877_v2 }
  0x61   :  { %1264 = vmatpush.bf16.msra.mxu3 %v1885_v3  ;;  %1226 = vmatmul.bf16.vlgmr.msra.gmra.mxu0 %v52_v8 }
  0x62   :  { %1270 = vmatpush.bf16.msrb.mxu0 %v1900_v4  ;;  %1239 = vmatmul.bf16.vlgmr.msra.gmra.mxu1 %v53_v10 }
  0x63   :  { %1283 = vmatpush.bf16.msrb.mxu1 %v1908_v5  ;;  %1252 = vmatmul.bf16.vlgmr.msra.gmra.mxu2 %v54_v9 }
  0x64   :  { %1296 = vmatpush.bf16.msrb.mxu2 %v1916_v6  ;;  %1265 = vmatmul.bf16.vlgmr.msra.gmra.mxu3 %v55_v11 }
  0x65   :  { %1309 = vmatpush.bf16.msrb.mxu3 %v1924_v7 }
  0x66   :  { %1271 = vmatpush.bf16.msrb.mxu0 %v1899_v12 }
  0x67   :  { %1284 = vmatpush.bf16.msrb.mxu1 %v1907_v38 }
  0x68   :  { %1297 = vmatpush.bf16.msrb.mxu2 %v1915_v40 }
  0x69   :  { %1310 = vmatpush.bf16.msrb.mxu3 %v1923_v39 }
  0x6a   :  { %1272 = vmatpush.bf16.msrb.mxu0 %v1898_v41 }
  0x6b   :  { %1285 = vmatpush.bf16.msrb.mxu1 %v1906_v13 }
  0x6c   :  { %1298 = vmatpush.bf16.msrb.mxu2 %v1914_v14 }
  0x6d   :  { %1311 = vmatpush.bf16.msrb.mxu3 %v1922_v15 }
  0x6e   :  { %1273 = vmatpush.bf16.msrb.mxu0 %v1897_v16 }
  0x6f   :  { %1286 = vmatpush.bf16.msrb.mxu1 %v1905_v17 }
  0x70   :  { %1299 = vmatpush.bf16.msrb.mxu2 %v1913_v18 }
  0x71   :  { %1312 = vmatpush.bf16.msrb.mxu3 %v1921_v19 }
  0x72   :  { %1274 = vmatpush.bf16.msrb.mxu0 %v1896_v20 }
  0x73   :  { %1287 = vmatpush.bf16.msrb.mxu1 %v1904_v21  ;;  %v345_v21 = vld [vmem:[#allocation2] sm:$0x3] }
  0x74   :  { %1300 = vmatpush.bf16.msrb.mxu2 %v1912_v22 }
  0x75   :  { %1313 = vmatpush.bf16.msrb.mxu3 %v1920_v23 }
  0x76   :  { %1275 = vmatpush.bf16.msrb.mxu0 %v1895_v24 }
  0x77   :  { %1288 = vmatpush.bf16.msrb.mxu1 %v1903_v25 }
  0x78   :  { %1301 = vmatpush.bf16.msrb.mxu2 %v1911_v26 }
  0x79   :  { %1314 = vmatpush.bf16.msrb.mxu3 %v1919_v27 }
  0x7a   :  { %1276 = vmatpush.bf16.msrb.mxu0 %v1894_v28 }
  0x7b   :  { %1289 = vmatpush.bf16.msrb.mxu1 %v1902_v29 }
  0x7c   :  { %1302 = vmatpush.bf16.msrb.mxu2 %v1910_v30 }
  0x7d   :  { %1315 = vmatpush.bf16.msrb.mxu3 %v1918_v31 }
  0x7e   :  { %1277 = vmatpush.bf16.msrb.mxu0 %v1893_v32 }
  0x7f   :  { %1290 = vmatpush.bf16.msrb.mxu1 %v1901_v33 }
  0x80   :  { %1303 = vmatpush.bf16.msrb.mxu2 %v1909_v34 }
  0x81   :  { %1316 = vmatpush.bf16.msrb.mxu3 %v1917_v35  ;;  %1278 = vmatmul.bf16.vlgmr.msrb.gmra.mxu0 %v56_v36 }
  0x82   :  { %1291 = vmatmul.bf16.vlgmr.msrb.gmra.mxu1 %v57_v37 }
  0x83   :  { %1304 = vmatmul.bf16.vlgmr.msrb.gmra.mxu2 %v58_v42 }
  0x84   :  { %1317 = vmatmul.bf16.vlgmr.msrb.gmra.mxu3 %v59_v43 }
  0x9e   :  { %v739_v44 = vpop.f32.mrf.mxu0 }
  0x9f   :  { %v752_v45 = vpop.f32.mrf.mxu1 }
  0xa0   :  { %v753_v60 = vadd.f32 %v752_v45, %v739_v44 }
  0xa6   :  { %v765_v46 = vpop.f32.mrf.mxu2  ;;  %v741_v49 = vpop.f32.mrf.mxu0 }
  0xa7   :  { %v778_v50 = vpop.f32.mrf.mxu3  ;;  %v754_v47 = vpop.f32.mrf.mxu1  ;;  %v766_v61 = vadd.f32 %v765_v46, %v753_v60 }
  0xa9   :  { %v779_v0 = vadd.f32 %v778_v50, %v766_v61 }
  0xae   :  { %v767_v51 = vpop.f32.mrf.mxu2 }
  0xaf   :  { %v780_v53 = vpop.f32.mrf.mxu3 }
  0xbe   :  { %v791_v54 = vpop.f32.mrf.mxu0 }
  0xbf   :  { %v804_v55 = vpop.f32.mrf.mxu1  ;;  %v792_v2 = vadd.f32 %v791_v54, %v779_v0 }
  0xc1   :  { %v805_v6 = vadd.f32 %v804_v55, %v792_v2 }
  0xc6   :  { %v817_v48 = vpop.f32.mrf.mxu2  ;;  %v793_v57 = vpop.f32.mrf.mxu0 }
  0xc7   :  { %v830_v56 = vpop.f32.mrf.mxu3  ;;  %v806_v52 = vpop.f32.mrf.mxu1  ;;  %v818_v8 = vadd.f32 %v817_v48, %v805_v6 }
  0xc9   :  { %v831_v11 = vadd.f32 %v830_v56, %v818_v8 }
  0xce   :  { %v819_v58 = vpop.f32.mrf.mxu2 }
  0xcf   :  { %v832_v59 = vpop.f32.mrf.mxu3 }
  0xde   :  { %v1227_v63 = vpop.f32.mrf.mxu0 }
  0xdf   :  { %v1240_v1 = vpop.f32.mrf.mxu1  ;;  %v1228_v12 = vadd.f32 %v1227_v63, %v831_v11 }
  0xe1   :  { %v1241_v38 = vadd.f32 %v1240_v1, %v1228_v12 }
  0xe6   :  { %v1253_v3 = vpop.f32.mrf.mxu2  ;;  %v1229_v5 = vpop.f32.mrf.mxu0 }
  0xe7   :  { %v1266_v4 = vpop.f32.mrf.mxu3  ;;  %v1242_v7 = vpop.f32.mrf.mxu1  ;;  %v1254_v40 = vadd.f32 %v1253_v3, %v1241_v38 }
  0xe9   :  { %v1267_v39 = vadd.f32 %v1266_v4, %v1254_v40 }
  0xee   :  { %v1255_v9 = vpop.f32.mrf.mxu2 }
  0xef   :  { %v1268_v10 = vpop.f32.mrf.mxu3 }
  0xfe   :  { %v1279_v41 = vpop.f32.mrf.mxu0 }
  0xff   :  { %v1292_v13 = vpop.f32.mrf.mxu1  ;;  %v1280_v14 = vadd.f32 %v1279_v41, %v1267_v39 }
 0x101   :  { %v1293_v15 = vadd.f32 %v1292_v13, %v1280_v14 }
 0x106   :  { %v1305_v16 = vpop.f32.mrf.mxu2  ;;  %v1281_v19 = vpop.f32.mrf.mxu0 }
 0x107   :  { %v1318_v17 = vpop.f32.mrf.mxu3  ;;  %v1306_v18 = vadd.f32 %v1305_v16, %v1293_v15  ;;  %v1294_v20 = vpop.f32.mrf.mxu1 }
 0x109   :  { %v1319_v22 = vadd.f32 %v1318_v17, %v1306_v18 }
 0x10b   :  { %v1322_v23 = vadd.f32 %v1319_v22, %v345_v21 }
 0x10d   :  { %1324 = vst.msk [vmem:[#allocation2] sm:$0x3] %vm25_vm0, %v1322_v23 }
 0x10e   :  { %v1307_v24 = vpop.f32.mrf.mxu2 }
 0x10f   :  { %v1320_v25 = vpop.f32.mrf.mxu3 }
 0x114   :  { %v1328_v26 = vld [vmem:[#allocation2] sm:$0x3] }
 0x115   :  { %v1329_v27 = vsel %vm25_vm0, %v1328_v26, -inf }
 0x116   :  { %1330 = vmax.xlane.f32.xlu0 %v1329_v27 }
 0x189   :  { %v1331_v28 = vpop.xlane.xlu0 %1330 }
 0x18a   :  { %v1332_v29 = vsub.f32 %v1328_v26, %v1331_v28 }
 0x18c   :  { %v1333_v30 = vmul.f32 1.442695, %v1332_v29 }
 0x18e   :  { %1990 = vpow2.f32 %v1333_v30 }
 0x194   :  { %v1991_v31 = vpop.eup %1990 }
 0x195   :  { %v1335_v32 = vsel %vm25_vm0, %v1991_v31, 0.0 }
 0x196   :  { %1336 = vadd.xlane.f32.xlu0 %v1335_v32 }
 0x209   :  { %v1337_v33 = vpop.xlane.xlu0 %1336 }
 0x20a   :  { %1992 = vlog2.f32 %v1337_v33 }
 0x210   :  { %v1993_v34 = vpop.eup %1992 }
 0x211   :  { %v1339_v35 = vmul.f32 0.6931472, %v1993_v34 }
 0x213   :  { %v1340_v36 = vadd.f32 %v1339_v35, %v1331_v28 }
 0x215   :  { %v1860_v37 = vadd.f32 -2.3025851, %v1340_v36 }
 0x217   :  { %1343 = vst.msk [vmem:[%s2455_s4] sm:$0x3] %vm1342_vm1, %v1860_v37 }

</bundles_post_ra>
